<compile_context>
chip_gen: v7x
topology: tpu7x:2x2x1
jax: 0.10.0
libtpu: 0.0.40
codegen_flags: <defaults>
</compile_context>

<pallas_src>
import functools

import jax
import jax.numpy as jnp
from jax.experimental import pallas as pl
from jax.experimental.pallas import tpu as pltpu

EPS = 1e-5
NEG_SLOPE = 0.2


def _round_up(a, b):
    return (a + b - 1) // b * b


def _tpu_vmem_capacity_bytes():
    try:
        return int(pltpu.get_tpu_info().vmem_capacity_bytes)
    except Exception:
        return 64 << 20   # conservative fallback (v7x per-TC VMEM)


# ---------------- Pass 1: conv matmul + per-core channel sum / sumsq ----------
def conv_stats_kernel(p_ref, w_ref, conv_ref, sum_ref, sumsq_ref):
    # [OC8, Kp] contracted with [TM, Kp] on K -> [OC8, TM], f32 MXU accumulate.
    conv = jax.lax.dot_general(
        w_ref[...], p_ref[...],
        dimension_numbers=(((1,), (1,)), ((), ())),
        preferred_element_type=jnp.float32)
    conv_ref[...] = conv.astype(conv_ref.dtype)          # bf16 intermediate

    @pl.when(pl.program_id(1) == 0)
    def _():
        sum_ref[...] = jnp.zeros_like(sum_ref)
        sumsq_ref[...] = jnp.zeros_like(sumsq_ref)

    # Per-core partial BN statistics (resident (1, OC8, 1) blocks, accumulated
    # across the "arbitrary" M-tile axis).  Padded rows/channels are all-zero.
    sum_ref[...] += jnp.sum(conv, axis=1, keepdims=True)[None]
    sumsq_ref[...] += jnp.sum(conv * conv, axis=1, keepdims=True)[None]


# ---------------- Pass 2: BatchNorm (scale/shift) + LeakyReLU -----------------
def bn_lrelu_kernel(conv_ref, sum_ref, sumsq_ref, gamma_ref, beta_ref, out_ref,
                    *, m_total):
    inv_m = 1.0 / m_total
    s = jnp.sum(sum_ref[...], axis=0)                    # reduce NC core partials
    ss = jnp.sum(sumsq_ref[...], axis=0)                 # -> (OC8, 1)
    mean = s * inv_m
    var = jnp.maximum(ss * inv_m - mean * mean, 0.0)     # biased var, clamped
    scale = gamma_ref[...] * jax.lax.rsqrt(var + EPS)
    shift = beta_ref[...] - mean * scale
    y = conv_ref[...].astype(jnp.float32) * scale + shift    # (OC8,TM)*(OC8,1)
    out_ref[...] = jnp.where(y > 0, y, NEG_SLOPE * y)        # LeakyReLU(0.2)


@functools.partial(jax.jit, static_argnames=("stride", "padding"))
def conv_block_discriminator(x, weight, gamma, beta, *, stride, padding):
    """x: [N, C, H, W] f32, weight: [OC, C, KH, KW] f32 -> [N, OC, OH, OW] f32."""
    N, C, H, W = x.shape
    OC, _, KH, KW = weight.shape
    OH = (H + 2 * padding - KH) // stride + 1
    OW = (W + 2 * padding - KW) // stride + 1

    M = N * OH * OW
    K = C * KH * KW
    Kp = _round_up(K, 128)
    OC8 = _round_up(OC, 8)

    # ---- chip-aware tile size + VMEM limit ----
    vmem_cap = _tpu_vmem_capacity_bytes()
    budget = min(40 << 20, vmem_cap // 2)                     # ~40 MiB cap (v7x safe)
    per_row = 4 * Kp + 4 * OC8 + 12 * OC8                     # dbl-buffered bytes / row
    fixed = 2 * OC8 * Kp + (2 << 20)                          # resident weight + slack
    tm_rows = (budget - fixed) // per_row if budget > fixed else 128
    TM = max(128, min(2048, (tm_rows // 128) * 128))
    TM = min(TM, _round_up(M, 128))

    num_tiles = pl.cdiv(M, TM)
    NC = 2 if num_tiles >= 2 else 1                           # split pass-1 over 2 TCs
    tiles_per_core = -(-num_tiles // NC)
    num_tiles_total = NC * tiles_per_core
    Mp = num_tiles_total * TM

    vmem_limit = int(min(max(budget + (8 << 20), 32 << 20),
                         max(vmem_cap - (8 << 20), 32 << 20)))

    # ---- im2col (plain-JAX glue): bf16, no transpose of the amplified array ----
    x_nhwc = jnp.transpose(x, (0, 2, 3, 1)).astype(jnp.bfloat16)   # small transpose
    xp = jnp.pad(x_nhwc, ((0, 0), (padding, padding), (padding, padding), (0, 0)))
    cols = []
    for kh in range(KH):
        for kw in range(KW):
            cols.append(xp[:, kh:kh + stride * OH:stride,
                           kw:kw + stride * OW:stride, :])          # [N,OH,OW,C]
    if Kp > K:   # fold the K zero-pad into the concat
        cols.append(jnp.zeros((N, OH, OW, Kp - K), jnp.bfloat16))
    patches = jnp.concatenate(cols, axis=-1).reshape(M, Kp)         # k=(kh*KW+kw)*C+c
    patches_p = jnp.pad(patches, ((0, Mp - M), (0, 0)))

    # Weight rows permuted to the (kh, kw, c) feature order, padded, bf16 (tiny).
    w_t = weight.transpose(0, 2, 3, 1).reshape(OC, K)
    w_t = jnp.pad(w_t, ((0, OC8 - OC), (0, Kp - K))).astype(jnp.bfloat16)   # [OC8,Kp]

    gamma2 = jnp.pad(gamma.astype(jnp.float32), (0, OC8 - OC)).reshape(OC8, 1)
    beta2 = jnp.pad(beta.astype(jnp.float32), (0, OC8 - OC)).reshape(OC8, 1)

    # ---- Pass 1: conv (bf16 intermediate) + per-core BN statistics ----
    conv_raw, ch_sum, ch_sumsq = pl.pallas_call(
        conv_stats_kernel,
        out_shape=(
            jax.ShapeDtypeStruct((OC8, Mp), jnp.bfloat16),
            jax.ShapeDtypeStruct((NC, OC8, 1), jnp.float32),
            jax.ShapeDtypeStruct((NC, OC8, 1), jnp.float32),
        ),
        grid=(NC, tiles_per_core),
        in_specs=[
            pl.BlockSpec((TM, Kp), lambda c, i: (c * tiles_per_core + i, 0)),
            pl.BlockSpec((OC8, Kp), lambda c, i: (0, 0)),
        ],
        out_specs=(
            pl.BlockSpec((OC8, TM), lambda c, i: (0, c * tiles_per_core + i)),
            pl.BlockSpec((1, OC8, 1), lambda c, i: (c, 0, 0)),   # resident per core
            pl.BlockSpec((1, OC8, 1), lambda c, i: (c, 0, 0)),   # resident per core
        ),
        compiler_params=pltpu.CompilerParams(
            dimension_semantics=("parallel", "arbitrary"),
            vmem_limit_bytes=vmem_limit),
    )(patches_p, w_t)

    # ---- Pass 2: normalize + LeakyReLU ----
    out_flat = pl.pallas_call(
        functools.partial(bn_lrelu_kernel, m_total=M),
        out_shape=jax.ShapeDtypeStruct((OC8, Mp), jnp.float32),
        grid=(num_tiles_total,),
        in_specs=[
            pl.BlockSpec((OC8, TM), lambda i: (0, i)),
            pl.BlockSpec((NC, OC8, 1), lambda i: (0, 0, 0)),
            pl.BlockSpec((NC, OC8, 1), lambda i: (0, 0, 0)),
            pl.BlockSpec((OC8, 1), lambda i: (0, 0)),
            pl.BlockSpec((OC8, 1), lambda i: (0, 0)),
        ],
        out_specs=pl.BlockSpec((OC8, TM), lambda i: (0, i)),
        compiler_params=pltpu.CompilerParams(
            dimension_semantics=("parallel",),
            vmem_limit_bytes=vmem_limit),
    )(conv_raw, ch_sum, ch_sumsq, gamma2, beta2)

    # [OC, M] -> [OC, N, OH, OW] -> NCHW
    out = out_flat[:OC, :M].reshape(OC, N, OH, OW)
    return out.transpose(1, 0, 2, 3)


def _reference(x, weight, gamma, beta, *, stride, padding):
    """Pure-JAX f32 reference for correctness checking."""
    conv = jax.lax.conv_general_dilated(
        x, weight, window_strides=(stride, stride),
        padding=[(padding, padding), (padding, padding)],
        dimension_numbers=("NCHW", "OIHW", "NCHW"))
    mean = jnp.mean(conv, axis=(0, 2, 3), keepdims=True)
    var = jnp.mean((conv - mean) ** 2, axis=(0, 2, 3), keepdims=True)
    xhat = (conv - mean) * jax.lax.rsqrt(var + EPS)
    y = gamma.reshape(1, -1, 1, 1) * xhat + beta.reshape(1, -1, 1, 1)
    return jnp.where(y > 0, y, NEG_SLOPE * y)


if __name__ == "__main__":
    key = jax.random.PRNGKey(0)
    k_x, k_w = jax.random.split(key)

    # conv_block(in_channel=4, out_channel=8, kernel_size=4, stride=2, padding=1,
    #            type='discriminator', last=False)
    N, C, H, W = 2, 4, 16, 16
    OC, KH, KW = 8, 4, 4
    stride, padding = 2, 1

    x = jax.random.normal(k_x, (N, C, H, W), dtype=jnp.float32)
    weight = 0.02 * jax.random.normal(k_w, (OC, C, KH, KW), dtype=jnp.float32)  # normal_(0, 0.02)
    gamma = jnp.ones((OC,), jnp.float32)   # BatchNorm2d default weight
    beta = jnp.zeros((OC,), jnp.float32)   # BatchNorm2d default bias

    out = conv_block_discriminator(x, weight, gamma, beta,
                                   stride=stride, padding=padding)
    out = jax.block_until_ready(out)

    ref = _reference(x, weight, gamma, beta, stride=stride, padding=padding)
    assert out.shape == ref.shape == (N, OC, H // stride, W // stride)
    # Tolerance loosened vs. the f32 reference because MXU operands and the
    # conv intermediate are bf16 (f32 accumulation).
    assert jnp.allclose(out, ref, rtol=5e-2, atol=5e-2)

    print("KERNEL_OK")
</pallas_src>

<mosaic_0001>
module attributes {stable_mosaic.version = 11 : i64} {
  func.func @conv_stats_kernel(%arg0: i32, %arg1: i32, %arg2: memref<128x128xbf16, #tpu.memory_space<vmem>>, %arg3: memref<8x128xbf16, #tpu.memory_space<vmem>>, %arg4: memref<8x128xbf16, #tpu.memory_space<vmem>>, %arg5: memref<1x8x1xf32, #tpu.memory_space<vmem>>, %arg6: memref<1x8x1xf32, #tpu.memory_space<vmem>>) attributes {dimension_semantics = [#tpu.dimension_semantics<parallel>, #tpu.dimension_semantics<arbitrary>], iteration_bounds = array<i64: 1, 1>, scalar_prefetch = 0 : i64, scratch_operands = 0 : i64, tpu.core_type = #tpu.core_type<tc>, window_params = [{transform_indices = @transform_0, window_bounds = array<i64: 128, 128>}, {pipeline_mode = #tpu.pipeline_mode<synchronous>, transform_indices = @transform_1, window_bounds = array<i64: 8, 128>}, {transform_indices = @transform_2, window_bounds = array<i64: 8, 128>}, {transform_indices = @transform_3, window_bounds = array<i64: 1, 8, 1>}, {transform_indices = @transform_4, window_bounds = array<i64: 1, 8, 1>}]} {
    %c0 = arith.constant 0 : index
    %c0_0 = arith.constant 0 : index
    %0 = vector.load %arg3[%c0, %c0_0] : memref<8x128xbf16, #tpu.memory_space<vmem>>, vector<8x128xbf16>
    %c0_1 = arith.constant 0 : index
    %c0_2 = arith.constant 0 : index
    %1 = vector.load %arg2[%c0_1, %c0_2] : memref<128x128xbf16, #tpu.memory_space<vmem>>, vector<128x128xbf16>
    %cst = arith.constant dense<0.000000e+00> : vector<8x128xf32>
    %2 = tpu.matmul %0, %1, %cst {dimension_numbers = #tpu.dot_dimension_numbers<[1], [1], [0], [0], [0, 0, 1, 0], [], []>} : vector<8x128xbf16>, vector<128x128xbf16>, vector<8x128xf32> -> vector<8x128xf32>
    %3 = arith.truncf %2 : vector<8x128xf32> to vector<8x128xbf16>
    %c0_3 = arith.constant 0 : index
    %c0_4 = arith.constant 0 : index
    %4 = vector.load %arg4[%c0_3, %c0_4] : memref<8x128xbf16, #tpu.memory_space<vmem>>, vector<8x128xbf16>
    tpu.vector_store %arg4[%c0_3, %c0_4], %3 {strides = array<i32>} : memref<8x128xbf16, #tpu.memory_space<vmem>>, vector<8x128xbf16>,
    %c0_i32 = arith.constant 0 : i32
    %5 = arith.cmpi eq, %arg1, %c0_i32 : i32
    %6 = arith.extui %5 : i1 to i32
    %c0_i32_5 = arith.constant 0 : i32
    %7 = arith.cmpi ne, %6, %c0_i32_5 : i32
    scf.if %7 {
      %cst_20 = arith.constant 0.000000e+00 : f32
      %21 = vector.broadcast %cst_20 : f32 to vector<1x8x1xf32>
      %c0_21 = arith.constant 0 : index
      %c0_22 = arith.constant 0 : index
      %c0_23 = arith.constant 0 : index
      %22 = vector.load %arg5[%c0_21, %c0_22, %c0_23] : memref<1x8x1xf32, #tpu.memory_space<vmem>>, vector<1x8x1xf32>
      tpu.vector_store %arg5[%c0_21, %c0_22, %c0_23], %21 {strides = array<i32>} : memref<1x8x1xf32, #tpu.memory_space<vmem>>, vector<1x8x1xf32>,
      %cst_24 = arith.constant 0.000000e+00 : f32
      %23 = vector.broadcast %cst_24 : f32 to vector<1x8x1xf32>
      %c0_25 = arith.constant 0 : index
      %c0_26 = arith.constant 0 : index
      %c0_27 = arith.constant 0 : index
      %24 = vector.load %arg6[%c0_25, %c0_26, %c0_27] : memref<1x8x1xf32, #tpu.memory_space<vmem>>, vector<1x8x1xf32>
      tpu.vector_store %arg6[%c0_25, %c0_26, %c0_27], %23 {strides = array<i32>} : memref<1x8x1xf32, #tpu.memory_space<vmem>>, vector<1x8x1xf32>,
    } else {
    }
    %c0_6 = arith.constant 0 : index
    %c0_7 = arith.constant 0 : index
    %c0_8 = arith.constant 0 : index
    %8 = vector.load %arg5[%c0_6, %c0_7, %c0_8] : memref<1x8x1xf32, #tpu.memory_space<vmem>>, vector<1x8x1xf32>
    %cst_9 = arith.constant dense<0.000000e+00> : vector<8xf32>
    %9 = vector.multi_reduction <add>, %2, %cst_9 [1] : vector<8x128xf32> to vector<8xf32>
    %10 = vector.shape_cast %9 : vector<8xf32> to vector<8x1xf32>
    %11 = vector.shape_cast %10 : vector<8x1xf32> to vector<1x8x1xf32>
    %12 = arith.addf %8, %11 : vector<1x8x1xf32>
    %c0_10 = arith.constant 0 : index
    %c0_11 = arith.constant 0 : index
    %c0_12 = arith.constant 0 : index
    %13 = vector.load %arg5[%c0_10, %c0_11, %c0_12] : memref<1x8x1xf32, #tpu.memory_space<vmem>>, vector<1x8x1xf32>
    tpu.vector_store %arg5[%c0_10, %c0_11, %c0_12], %12 {strides = array<i32>} : memref<1x8x1xf32, #tpu.memory_space<vmem>>, vector<1x8x1xf32>,
    %c0_13 = arith.constant 0 : index
    %c0_14 = arith.constant 0 : index
    %c0_15 = arith.constant 0 : index
    %14 = vector.load %arg6[%c0_13, %c0_14, %c0_15] : memref<1x8x1xf32, #tpu.memory_space<vmem>>, vector<1x8x1xf32>
    %15 = arith.mulf %2, %2 : vector<8x128xf32>
    %cst_16 = arith.constant dense<0.000000e+00> : vector<8xf32>
    %16 = vector.multi_reduction <add>, %15, %cst_16 [1] : vector<8x128xf32> to vector<8xf32>
    %17 = vector.shape_cast %16 : vector<8xf32> to vector<8x1xf32>
    %18 = vector.shape_cast %17 : vector<8x1xf32> to vector<1x8x1xf32>
    %19 = arith.addf %14, %18 : vector<1x8x1xf32>
    %c0_17 = arith.constant 0 : index
    %c0_18 = arith.constant 0 : index
    %c0_19 = arith.constant 0 : index
    %20 = vector.load %arg6[%c0_17, %c0_18, %c0_19] : memref<1x8x1xf32, #tpu.memory_space<vmem>>, vector<1x8x1xf32>
    tpu.vector_store %arg6[%c0_17, %c0_18, %c0_19], %19 {strides = array<i32>} : memref<1x8x1xf32, #tpu.memory_space<vmem>>, vector<1x8x1xf32>,
    return
  }
  func.func @transform_0(%arg0: i32, %arg1: i32) -> (i32, i32) {
    %c1_i32 = arith.constant 1 : i32
    %0 = arith.muli %arg0, %c1_i32 : i32
    %1 = arith.addi %0, %arg1 : i32
    %c0_i32 = arith.constant 0 : i32
    %c0_i32_0 = arith.constant 0 : i32
    return %1, %c0_i32 : i32, i32
  }
  func.func @transform_1(%arg0: i32, %arg1: i32) -> (i32, i32) {
    %c0_i32 = arith.constant 0 : i32
    %c0_i32_0 = arith.constant 0 : i32
    %c0_i32_1 = arith.constant 0 : i32
    return %c0_i32, %c0_i32_0 : i32, i32
  }
  func.func @transform_2(%arg0: i32, %arg1: i32) -> (i32, i32) {
    %c1_i32 = arith.constant 1 : i32
    %0 = arith.muli %arg0, %c1_i32 : i32
    %1 = arith.addi %0, %arg1 : i32
    %c0_i32 = arith.constant 0 : i32
    %c0_i32_0 = arith.constant 0 : i32
    return %c0_i32, %1 : i32, i32
  }
  func.func @transform_3(%arg0: i32, %arg1: i32) -> (i32, i32, i32) {
    %c0_i32 = arith.constant 0 : i32
    %c0_i32_0 = arith.constant 0 : i32
    %c0_i32_1 = arith.constant 0 : i32
    return %arg0, %c0_i32, %c0_i32_0 : i32, i32, i32
  }
  func.func @transform_4(%arg0: i32, %arg1: i32) -> (i32, i32, i32) {
    %c0_i32 = arith.constant 0 : i32
    %c0_i32_0 = arith.constant 0 : i32
    %c0_i32_1 = arith.constant 0 : i32
    return %arg0, %c0_i32, %c0_i32_0 : i32, i32, i32
  }
}

module attributes {stable_mosaic.version = 11 : i64} {
  func.func @bn_lrelu_kernel(%arg0: i32, %arg1: memref<8x128xbf16, #tpu.memory_space<vmem>>, %arg2: memref<1x8x1xf32, #tpu.memory_space<vmem>>, %arg3: memref<1x8x1xf32, #tpu.memory_space<vmem>>, %arg4: memref<8x1xf32, #tpu.memory_space<vmem>>, %arg5: memref<8x1xf32, #tpu.memory_space<vmem>>, %arg6: memref<8x128xf32, #tpu.memory_space<vmem>>) attributes {dimension_semantics = [#tpu.dimension_semantics<parallel>], iteration_bounds = array<i64: 1>, scalar_prefetch = 0 : i64, scratch_operands = 0 : i64, tpu.core_type = #tpu.core_type<tc>, window_params = [{transform_indices = @transform_0, window_bounds = array<i64: 8, 128>}, {pipeline_mode = #tpu.pipeline_mode<synchronous>, transform_indices = @transform_1, window_bounds = array<i64: 1, 8, 1>}, {pipeline_mode = #tpu.pipeline_mode<synchronous>, transform_indices = @transform_2, window_bounds = array<i64: 1, 8, 1>}, {pipeline_mode = #tpu.pipeline_mode<synchronous>, transform_indices = @transform_3, window_bounds = array<i64: 8, 1>}, {pipeline_mode = #tpu.pipeline_mode<synchronous>, transform_indices = @transform_4, window_bounds = array<i64: 8, 1>}, {transform_indices = @transform_5, window_bounds = array<i64: 8, 128>}]} {
    %c0 = arith.constant 0 : index
    %c0_0 = arith.constant 0 : index
    %c0_1 = arith.constant 0 : index
    %0 = vector.load %arg2[%c0, %c0_0, %c0_1] : memref<1x8x1xf32, #tpu.memory_space<vmem>>, vector<1x8x1xf32>
    %cst = arith.constant dense<0.000000e+00> : vector<8x1xf32>
    %1 = vector.multi_reduction <add>, %0, %cst [0] : vector<1x8x1xf32> to vector<8x1xf32>
    %c0_2 = arith.constant 0 : index
    %c0_3 = arith.constant 0 : index
    %c0_4 = arith.constant 0 : index
    %2 = vector.load %arg3[%c0_2, %c0_3, %c0_4] : memref<1x8x1xf32, #tpu.memory_space<vmem>>, vector<1x8x1xf32>
    %cst_5 = arith.constant dense<0.000000e+00> : vector<8x1xf32>
    %3 = vector.multi_reduction <add>, %2, %cst_5 [0] : vector<1x8x1xf32> to vector<8x1xf32>
    %cst_6 = arith.constant 7.812500e-03 : f32
    %4 = vector.broadcast %cst_6 : f32 to vector<8x1xf32>
    %5 = arith.mulf %1, %4 : vector<8x1xf32>
    %cst_7 = arith.constant 7.812500e-03 : f32
    %6 = vector.broadcast %cst_7 : f32 to vector<8x1xf32>
    %7 = arith.mulf %3, %6 : vector<8x1xf32>
    %8 = arith.mulf %5, %5 : vector<8x1xf32>
    %9 = arith.subf %7, %8 : vector<8x1xf32>
    %cst_8 = arith.constant 0.000000e+00 : f32
    %10 = vector.broadcast %cst_8 : f32 to vector<8x1xf32>
    %11 = arith.maximumf %9, %10 : vector<8x1xf32>
    %c0_9 = arith.constant 0 : index
    %c0_10 = arith.constant 0 : index
    %12 = vector.load %arg4[%c0_9, %c0_10] : memref<8x1xf32, #tpu.memory_space<vmem>>, vector<8x1xf32>
    %cst_11 = arith.constant 9.99999974E-6 : f32
    %13 = vector.broadcast %cst_11 : f32 to vector<8x1xf32>
    %14 = arith.addf %11, %13 : vector<8x1xf32>
    %15 = math.rsqrt %14 : vector<8x1xf32>
    %16 = arith.mulf %12, %15 : vector<8x1xf32>
    %c0_12 = arith.constant 0 : index
    %c0_13 = arith.constant 0 : index
    %17 = vector.load %arg5[%c0_12, %c0_13] : memref<8x1xf32, #tpu.memory_space<vmem>>, vector<8x1xf32>
    %18 = arith.mulf %5, %16 : vector<8x1xf32>
    %19 = arith.subf %17, %18 : vector<8x1xf32>
    %c0_14 = arith.constant 0 : index
    %c0_15 = arith.constant 0 : index
    %20 = vector.load %arg1[%c0_14, %c0_15] : memref<8x128xbf16, #tpu.memory_space<vmem>>, vector<8x128xbf16>
    %21 = arith.extf %20 : vector<8x128xbf16> to vector<8x128xf32>
    %22 = vector.broadcast %16 : vector<8x1xf32> to vector<8x128xf32>
    %23 = arith.mulf %21, %22 : vector<8x128xf32>
    %24 = vector.broadcast %19 : vector<8x1xf32> to vector<8x128xf32>
    %25 = arith.addf %23, %24 : vector<8x128xf32>
    %cst_16 = arith.constant 0.000000e+00 : f32
    %26 = vector.broadcast %cst_16 : f32 to vector<8x128xf32>
    %27 = arith.cmpf ogt, %25, %26 : vector<8x128xf32>
    %cst_17 = arith.constant 2.000000e-01 : f32
    %28 = vector.broadcast %cst_17 : f32 to vector<8x128xf32>
    %29 = arith.mulf %28, %25 : vector<8x128xf32>
    %30 = arith.select %27, %25, %29 : vector<8x128xi1>, vector<8x128xf32>
    %c0_18 = arith.constant 0 : index
    %c0_19 = arith.constant 0 : index
    %31 = vector.load %arg6[%c0_18, %c0_19] : memref<8x128xf32, #tpu.memory_space<vmem>>, vector<8x128xf32>
    tpu.vector_store %arg6[%c0_18, %c0_19], %30 {strides = array<i32>} : memref<8x128xf32, #tpu.memory_space<vmem>>, vector<8x128xf32>,
    return
  }
  func.func @transform_0(%arg0: i32) -> (i32, i32) {
    %c0_i32 = arith.constant 0 : i32
    %c0_i32_0 = arith.constant 0 : i32
    return %c0_i32, %arg0 : i32, i32
  }
  func.func @transform_1(%arg0: i32) -> (i32, i32, i32) {
    %c0_i32 = arith.constant 0 : i32
    %c0_i32_0 = arith.constant 0 : i32
    %c0_i32_1 = arith.constant 0 : i32
    %c0_i32_2 = arith.constant 0 : i32
    return %c0_i32, %c0_i32_0, %c0_i32_1 : i32, i32, i32
  }
  func.func @transform_2(%arg0: i32) -> (i32, i32, i32) {
    %c0_i32 = arith.constant 0 : i32
    %c0_i32_0 = arith.constant 0 : i32
    %c0_i32_1 = arith.constant 0 : i32
    %c0_i32_2 = arith.constant 0 : i32
    return %c0_i32, %c0_i32_0, %c0_i32_1 : i32, i32, i32
  }
  func.func @transform_3(%arg0: i32) -> (i32, i32) {
    %c0_i32 = arith.constant 0 : i32
    %c0_i32_0 = arith.constant 0 : i32
    %c0_i32_1 = arith.constant 0 : i32
    return %c0_i32, %c0_i32_0 : i32, i32
  }
  func.func @transform_4(%arg0: i32) -> (i32, i32) {
    %c0_i32 = arith.constant 0 : i32
    %c0_i32_0 = arith.constant 0 : i32
    %c0_i32_1 = arith.constant 0 : i32
    return %c0_i32, %c0_i32_0 : i32, i32
  }
  func.func @transform_5(%arg0: i32) -> (i32, i32) {
    %c0_i32 = arith.constant 0 : i32
    %c0_i32_0 = arith.constant 0 : i32
    return %c0_i32, %arg0 : i32, i32
  }
}

</mosaic_0001>

<bundles_post_ra>
// kernel: conv_block_discriminator.3
= control target key start
LH: loop header
LB: loop body
LE: loop exit
PB: predicated region body
PF: predicated region fallthrough
CT: control target
= control target key end

     0   :  { %v62_v0 = vmov 0   ;;  %s111_s1 = inlined_call_operand.vmem [shape: f32[1,8,1], index: 1, kind: input, shape index: {}]   ;;  %s112_s2 = inlined_call_operand.vmem [shape: f32[1,8,1], index: 2, kind: input, shape index: {}]   ;;  %s113_s3 = inlined_call_operand.vmem [shape: f32[8,1], index: 3, kind: input, shape index: {}]   ;;  %s114_s4 = inlined_call_operand.vmem [shape: f32[8,1], index: 4, kind: input, shape index: {}]   ;;  %s115_s0 = inlined_call_operand.vmem [shape: bf16[8,128], index: 0, kind: input, shape index: {}]   ;;  %s116_s5 = inlined_call_operand.vmem [shape: f32[8,128], index: 5, kind: output, shape index: {}]  }
   0x1   :  { %59 = vset.pattern.permute.xlu0 %v62_v0  ;;  %v20_v1 = vld [vmem:[%s111_s1] sm:$0xff] }
   0x2   :  { %v22_v2 = vld [vmem:[%s112_s2] sm:$0xff]  ;;  %v24_v3 = vmul.f32 0.0078125, %v20_v1 }
   0x3   :  { %v25_v4 = vmul.f32 0.0078125, %v22_v2  ;;  %v29_v9 = vld [vmem:[%s113_s3] sm:$0xff] }
   0x4   :  { %v26_v5 = vmul.f32 %v24_v3, %v24_v3  ;;  %v33_v12 = vld [vmem:[%s114_s4] sm:$0xff] }
   0x5   :  { %v36_v15 = vld [vmem:[%s115_s0] sm:$0xf] }
   0x6   :  { %v27_v6 = vsub.f32 %v25_v4, %v26_v5  ;;  %v37_v16 = vunpack.c.l.bf16 %v36_v15 }
   0x8   :  { %v28_v7 = vmax.f32 %v27_v6, 0.0 }
   0xa   :  { %v30_v8 = vadd.f32 1e-05, %v28_v7 }
   0xc   :  { %60 = vrsqrt.f32 %v30_v8 }
  0x16   :  { %v61_v10 = vpop.eup %60 }
  0x17   :  { %v32_v11 = vmul.f32 %v61_v10, %v29_v9 }
  0x19   :  { %40 = vperm.xlu0 %59, %v32_v11   ;;  %v34_v13 = vmul.f32 %v32_v11, %v24_v3 }
  0x1b   :  { %v35_v14 = vsub.f32 %v33_v12, %v34_v13 }
  0x1d   :  { %46 = vperm.xlu0 %59, %v35_v14  }
  0x98   :  { %v41_v17 = vpop.permute.xlu0 %40 }
  0x99   :  { %v43_v18 = vmul.f32 %v41_v17, %v37_v16 }
  0x9c   :  { %v47_v19 = vpop.permute.xlu0 %46 }
  0x9d   :  { %v49_v20 = vadd.f32 %v47_v19, %v43_v18 }
  0x9f   :  { %vm50_vm0 = vcmp.gt.f32.partialorder %v49_v20, 0.0  ;;  %v51_v21 = vmul.f32 0.2, %v49_v20 }
  0xa1   :  { %v52_v22 = vsel %vm50_vm0, %v49_v20, %v51_v21 }
  0xa2   :  { %53 = vst [vmem:[%s116_s5] sm:$0xff] %v52_v22 }

// kernel: conv_block_discriminator.2
= control target key start
LH: loop header
LB: loop body
LE: loop exit
PB: predicated region body
PF: predicated region fallthrough
CT: control target
= control target key end

     0   :  { %v258_v0 = vmov 0.0   ;;  %vm259_vm0 = vmmov 0   ;;  %vm159_vm1 = vcmask 7168   ;;  %s337_s0 = inlined_call_operand.vmem [shape: bf16[128,128], index: 0, kind: input, shape index: {}]   ;;  %s338_s1 = inlined_call_operand.vmem [shape: bf16[8,128], index: 1, kind: input, shape index: {}]   ;;  %s339_s3 = inlined_call_operand.vmem [shape: f32[1,8,1], index: 3, kind: output, shape index: {1}]   ;;  %s340_s2 = inlined_call_operand.vmem [shape: bf16[8,128], index: 2, kind: output, shape index: {0}]   ;;  %s341_s4 = inlined_call_operand.vmem [shape: f32[1,8,1], index: 4, kind: output, shape index: {2}]  }
   0x1   :  { %228 = vmatprep.subr.bf16.mxu0 %v258_v0  ;;  %v250_v1 = vld [vmem:[%s337_s0] sm:$0xff]   ;;  %244 = vmatprep.mubr.msk.bf16.mxu0 %vm259_vm0, %v258_v0  ;;  %v251_v2 = vld [vmem:[%s337_s0 + $0x8] sm:$0xff]   ;;  %v252_v3 = vld [vmem:[%s337_s0 + $0x10] sm:$0xff]   ;;  %160 = vst.msk [vmem:[%s339_s3] sm:$0xff] %vm159_vm1, %v258_v0 }
   0x2   :  { %229 = vmatpush3.bf16.xpose.msra.mxu0 %v250_v1  ;;  %v253_v4 = vld [vmem:[%s337_s0 + $0x18] sm:$0xff]   ;;  %v254_v5 = vld [vmem:[%s337_s0 + $0x20] sm:$0xff]   ;;  %v255_v6 = vld [vmem:[%s337_s0 + $0x28] sm:$0xff]   ;;  %161 = vst.msk [vmem:[%s341_s4] sm:$0xff] %vm159_vm1, %v258_v0 }
   0x3   :  { %230 = vmatprep.subr.bf16.mxu0 %v258_v0  ;;  %v256_v7 = vld [vmem:[%s337_s0 + $0x30] sm:$0xff]   ;;  %v257_v8 = vld [vmem:[%s337_s0 + $0x38] sm:$0xff]   ;;  %v48_v9 = vld [vmem:[%s338_s1] sm:$0xf] }
   0x8   :  { %v162_v16 = vld [vmem:[%s339_s3] sm:$0xff] }
   0x9   :  { %v168_v19 = vld [vmem:[%s341_s4] sm:$0xff] }
   0xa   :  { %231 = vmatpush3.bf16.xpose.msra.mxu0 %v251_v2 }
   0xb   :  { %232 = vmatprep.subr.bf16.mxu0 %v258_v0 }
  0x12   :  { %233 = vmatpush3.bf16.xpose.msra.mxu0 %v252_v3 }
  0x13   :  { %234 = vmatprep.subr.bf16.mxu0 %v258_v0 }
  0x1a   :  { %235 = vmatpush3.bf16.xpose.msra.mxu0 %v253_v4 }
  0x1b   :  { %236 = vmatprep.subr.bf16.mxu0 %v258_v0 }
  0x22   :  { %237 = vmatpush3.bf16.xpose.msra.mxu0 %v254_v5 }
  0x23   :  { %238 = vmatprep.subr.bf16.mxu0 %v258_v0 }
  0x2a   :  { %239 = vmatpush3.bf16.xpose.msra.mxu0 %v255_v6 }
  0x2b   :  { %240 = vmatprep.subr.bf16.mxu0 %v258_v0 }
  0x32   :  { %241 = vmatpush3.bf16.xpose.msra.mxu0 %v256_v7 }
  0x33   :  { %242 = vmatprep.subr.bf16.mxu0 %v258_v0 }
  0x3a   :  { %243 = vmatpush3.bf16.xpose.msra.mxu0 %v257_v8 }
  0x41   :  { %245 = vmatmul.mubr.bf16.vlgmr.msra.gmra.mrb[0].mxu0 %v48_v9 }
 0x114   :  { %v147_v10 = vpop.f32.mrb[0].mxu0 }
 0x115   :  { %v153_v11 = vpack.c.bf16 %v147_v10, %v147_v10  ;;  %163 = vadd.xlane.f32.xlu0 %v147_v10  ;;  %v246_v12 = vpop.f32.mrb[1].mxu0  ;;  %v169_v15 = vmul.f32 %v147_v10, %v147_v10 }
 0x116   :  { %v150_v13 = vpop.f32.mrb[2].mxu0 }
 0x117   :  { %154 = vst [vmem:[%s340_s2] sm:$0xf] %v153_v11  ;;  %v247_v14 = vpop.f32.mrb[3].mxu0 }
 0x119   :  { %170 = vadd.xlane.f32.xlu0 %v169_v15 }
 0x1a2   :  { %v164_v17 = vpop.xlane.xlu0 %163 }
 0x1a3   :  { %v165_v18 = vadd.f32 %v164_v17, %v162_v16 }
 0x1a5   :  { %167 = vst.msk [vmem:[%s339_s3] sm:$0xff] %vm159_vm1, %v165_v18 }
 0x1a6   :  { %v171_v20 = vpop.xlane.xlu0 %170 }
 0x1a7   :  { %v172_v21 = vadd.f32 %v171_v20, %v168_v19 }
 0x1a9   :  { %173 = vst.msk [vmem:[%s341_s4] sm:$0xff] %vm159_vm1, %v172_v21 }

</bundles_post_ra>
